<compile_context>
chip_gen: v6e
topology: v6e:2x2x1
jax: 0.10.0
libtpu: 0.0.40
codegen_flags: <defaults>
</compile_context>

<pallas_src>
import functools

import jax
import jax.numpy as jnp
from jax.experimental import pallas as pl
from jax.experimental.pallas import tpu as pltpu


def _affine_clamp_kernel(x_ref, w_ref, b_ref, out_ref, *, min_value, max_value):
    # Single folded affine: y = x @ W + b   (W = w1@w2, b = b1@w2 + b2).
    y = jnp.dot(x_ref[...], w_ref[...], preferred_element_type=jnp.float32)
    y = (y + b_ref[...]).astype(out_ref.dtype)                       # (tb, 10)
    y_min = jnp.maximum(y, jnp.asarray(min_value, y.dtype))          # clamp(min=)
    y_max = jnp.minimum(y, jnp.asarray(max_value, y.dtype))          # clamp(max=)
    # Lane-dense writeback: one (tb, 30) store instead of three masked (tb, 10)
    # stores.  The concat's lane shifts run on the XLU (separate slot), while the
    # store-slot count drops 3x.
    out_ref[...] = jnp.concatenate([y, y_min, y_max], axis=-1)


def fold_affine(w1, b1, w2, b2):
    """Fold Linear(20,40) -> Linear(40,10) into one affine (W, b).

    Exact (no nonlinearity in between):
      (x @ w1 + b1) @ w2 + b2 == x @ (w1 @ w2) + (b1 @ w2 + b2)
    Precompute once when weights are static so per-call cost is just the kernel.
    """
    w = jnp.dot(w1, w2, preferred_element_type=jnp.float32).astype(w1.dtype)
    b = (jnp.dot(b1, w2, preferred_element_type=jnp.float32) + b2).astype(b1.dtype)
    return w, b


def mlp_clamp(x, w, b, *, min_value, max_value, block_rows=8192):
    """x: (B, 20); w: (20, 10) folded weight; b: (1, 10) folded bias.

    Returns (y, clamp(y, min=min_value), clamp(y, max=max_value)).
    min_value / max_value are required keyword args (no silent defaults).
    """
    B, d_in = x.shape
    d_out = w.shape[1]

    # --- batch tiling -------------------------------------------------------
    # VMEM, with lane padding to 128 (f32):
    #   x tile (tb, 20)  -> tb * 512 B        out tile (tb, 30) -> tb * 512 B
    #   double-buffered total ≈ tb * 2 KiB  ->  tb = 8192 ≈ 16 MiB.
    # That sits comfortably under the explicit 48 MiB limit below and under
    # v7x's 64 MiB physical VMEM per TensorCore.  On v6e (128 MiB VMEM),
    # block_rows up to ~16384 is fine; on v5e keep block_rows <= 8192.
    if B <= block_rows:
        tb = B                       # one block == full batch dim (always legal)
        num_blocks = 1
    else:
        tb = (block_rows // 8) * 8
        num_blocks = -(-B // tb)
        # v7x has two TensorCores: keep the "parallel" grid length even so both
        # cores get equal work (harmless on single-TC v5e/v6e).
        if num_blocks % 2 == 1:
            num_blocks += 1
            tb = ((-(-B // num_blocks)) + 7) // 8 * 8
            num_blocks = -(-B // tb)
    # No jnp.pad to a multiple of tb and no trailing slice: a ragged tail is a
    # partial final block (masked writeback), so there is no extra HBM restream.

    kernel = functools.partial(_affine_clamp_kernel,
                               min_value=float(min_value),
                               max_value=float(max_value))

    itemsize = jnp.dtype(x.dtype).itemsize
    bytes_accessed = (B * d_in + 3 * B * d_out) * itemsize \
        + (w.size + b.size) * jnp.dtype(w.dtype).itemsize

    out = pl.pallas_call(
        kernel,
        out_shape=jax.ShapeDtypeStruct((B, 3 * d_out), x.dtype),
        grid=(num_blocks,),
        in_specs=[
            pl.BlockSpec((tb, d_in), lambda i: (i, 0)),      # x tile
            pl.BlockSpec((d_in, d_out), lambda i: (0, 0)),   # folded W (20,10), resident
            pl.BlockSpec((1, d_out), lambda i: (0, 0)),      # folded b (1,10),  resident
        ],
        # One lane-concatenated output slab -> single writeback stream.
        out_specs=pl.BlockSpec((tb, 3 * d_out), lambda i: (i, 0)),
        compiler_params=pltpu.CompilerParams(
            dimension_semantics=("parallel",),               # megacore split on v7x
            vmem_limit_bytes=48 * 1024 * 1024),              # explicit; < 64 MiB v7x physical
        cost_estimate=pl.CostEstimate(
            flops=2 * B * d_in * d_out,
            transcendentals=0,
            bytes_accessed=bytes_accessed),
    )(x, w, b)

    y = out[:, :d_out]
    y_min = out[:, d_out:2 * d_out]
    y_max = out[:, 2 * d_out:]
    return y, y_min, y_max


if __name__ == "__main__":
    key = jax.random.PRNGKey(0)
    kx, kw1, kb1, kw2, kb2 = jax.random.split(key, 5)

    B, D_IN, D_HID, D_OUT = 64, 20, 40, 10   # module: (·, 20) -> 40 -> 10
    min_value = 1.0
    max_value = 1.0

    x1 = jax.random.normal(kx, (B, D_IN), dtype=jnp.float32)
    # Deterministic "Linear" params (torch-style uniform init bounds, fixed seed).
    bound1 = 1.0 / (D_IN ** 0.5)
    w1 = jax.random.uniform(kw1, (D_IN, D_HID), minval=-bound1, maxval=bound1,
                            dtype=jnp.float32)
    b1 = jax.random.uniform(kb1, (1, D_HID), minval=-bound1, maxval=bound1,
                            dtype=jnp.float32)
    bound2 = 1.0 / (D_HID ** 0.5)
    w2 = jax.random.uniform(kw2, (D_HID, D_OUT), minval=-bound2, maxval=bound2,
                            dtype=jnp.float32)
    b2 = jax.random.uniform(kb2, (1, D_OUT), minval=-bound2, maxval=bound2,
                            dtype=jnp.float32)

    # One-time fold of the two affine layers (hoisted out of the per-call path).
    w, b = fold_affine(w1, b1, w2, b2)

    y, y_clamp_min, y_clamp_max = jax.block_until_ready(
        mlp_clamp(x1, w, b, min_value=min_value, max_value=max_value))

    # Reference check against the un-folded two-matmul form.
    y_ref = (x1 @ w1 + b1) @ w2 + b2
    assert jnp.allclose(y, y_ref, atol=1e-5)
    assert jnp.allclose(y_clamp_min, jnp.maximum(y_ref, min_value), atol=1e-5)
    assert jnp.allclose(y_clamp_max, jnp.minimum(y_ref, max_value), atol=1e-5)

    # Module's original single-row case (B=1) — exercises the tb == B path.
    x_tiny = x1[:1]
    yt, ytmin, ytmax = jax.block_until_ready(
        mlp_clamp(x_tiny, w, b, min_value=min_value, max_value=max_value))
    yt_ref = (x_tiny @ w1 + b1) @ w2 + b2
    assert yt.shape == (1, D_OUT)
    assert jnp.allclose(yt, yt_ref, atol=1e-5)
    assert jnp.allclose(ytmin, jnp.maximum(yt_ref, min_value), atol=1e-5)
    assert jnp.allclose(ytmax, jnp.minimum(yt_ref, max_value), atol=1e-5)

    print("KERNEL_OK")
</pallas_src>

<mosaic_0001>
module attributes {stable_mosaic.version = 11 : i64} {
  func.func @_affine_clamp_kernel(%arg0: i32, %arg1: memref<64x20xf32, #tpu.memory_space<vmem>>, %arg2: memref<20x10xf32, #tpu.memory_space<vmem>>, %arg3: memref<1x10xf32, #tpu.memory_space<vmem>>, %arg4: memref<64x30xf32, #tpu.memory_space<vmem>>) attributes {dimension_semantics = [#tpu.dimension_semantics<parallel>], iteration_bounds = array<i64: 1>, scalar_prefetch = 0 : i64, scratch_operands = 0 : i64, tpu.core_type = #tpu.core_type<tc>, window_params = [{transform_indices = @transform_0, window_bounds = array<i64: 64, 20>}, {pipeline_mode = #tpu.pipeline_mode<synchronous>, transform_indices = @transform_1, window_bounds = array<i64: 20, 10>}, {pipeline_mode = #tpu.pipeline_mode<synchronous>, transform_indices = @transform_2, window_bounds = array<i64: 1, 10>}, {transform_indices = @transform_3, window_bounds = array<i64: 64, 30>}]} {
    %c0 = arith.constant 0 : index
    %c0_0 = arith.constant 0 : index
    %0 = vector.load %arg1[%c0, %c0_0] : memref<64x20xf32, #tpu.memory_space<vmem>>, vector<64x20xf32>
    %c0_1 = arith.constant 0 : index
    %c0_2 = arith.constant 0 : index
    %1 = vector.load %arg2[%c0_1, %c0_2] : memref<20x10xf32, #tpu.memory_space<vmem>>, vector<20x10xf32>
    %cst = arith.constant dense<0.000000e+00> : vector<64x10xf32>
    %2 = tpu.matmul %0, %1, %cst {dimension_numbers = #tpu.dot_dimension_numbers<[1], [0], [0], [1], [0, 0, 1, 1], [], []>} : vector<64x20xf32>, vector<20x10xf32>, vector<64x10xf32> -> vector<64x10xf32>
    %c0_3 = arith.constant 0 : index
    %c0_4 = arith.constant 0 : index
    %3 = vector.load %arg3[%c0_3, %c0_4] : memref<1x10xf32, #tpu.memory_space<vmem>>, vector<1x10xf32>
    %4 = vector.broadcast %3 : vector<1x10xf32> to vector<64x10xf32>
    %5 = arith.addf %2, %4 : vector<64x10xf32>
    %cst_5 = arith.constant 1.000000e+00 : f32
    %6 = vector.broadcast %cst_5 : f32 to vector<64x10xf32>
    %7 = arith.maximumf %5, %6 : vector<64x10xf32>
    %cst_6 = arith.constant 1.000000e+00 : f32
    %8 = vector.broadcast %cst_6 : f32 to vector<64x10xf32>
    %9 = arith.minimumf %5, %8 : vector<64x10xf32>
    %10 = tpu.concatenate %5, %7, %9 in 1 : vector<64x10xf32>, vector<64x10xf32>, vector<64x10xf32> -> vector<64x30xf32>
    %c0_7 = arith.constant 0 : index
    %c0_8 = arith.constant 0 : index
    %11 = vector.load %arg4[%c0_7, %c0_8] : memref<64x30xf32, #tpu.memory_space<vmem>>, vector<64x30xf32>
    tpu.vector_store %arg4[%c0_7, %c0_8], %10 {strides = array<i32>} : memref<64x30xf32, #tpu.memory_space<vmem>>, vector<64x30xf32>,
    return
  }
  func.func @transform_0(%arg0: i32) -> (i32, i32) {
    %c0_i32 = arith.constant 0 : i32
    %c0_i32_0 = arith.constant 0 : i32
    return %arg0, %c0_i32 : i32, i32
  }
  func.func @transform_1(%arg0: i32) -> (i32, i32) {
    %c0_i32 = arith.constant 0 : i32
    %c0_i32_0 = arith.constant 0 : i32
    %c0_i32_1 = arith.constant 0 : i32
    return %c0_i32, %c0_i32_0 : i32, i32
  }
  func.func @transform_2(%arg0: i32) -> (i32, i32) {
    %c0_i32 = arith.constant 0 : i32
    %c0_i32_0 = arith.constant 0 : i32
    %c0_i32_1 = arith.constant 0 : i32
    return %c0_i32, %c0_i32_0 : i32, i32
  }
  func.func @transform_3(%arg0: i32) -> (i32, i32) {
    %c0_i32 = arith.constant 0 : i32
    %c0_i32_0 = arith.constant 0 : i32
    return %arg0, %c0_i32 : i32, i32
  }
}

</mosaic_0001>

<bundles_post_ra>
// kernel: tpu_custom_call.1
= control target key start
LH: loop header
LB: loop body
LE: loop exit
PB: predicated region body
PF: predicated region fallthrough
CT: control target
= control target key end

     0   :  { %vm57_vm0 = vcmask 1043456   ;;  %vm32_vm1 = vcmask 162816   ;;  %s323_s8 = smov 10   ;;  %vm246_vm2 = vcmask 80896   ;;  %vm263_vm3 = vcmask 244736   ;;  %s453_s1 = inlined_call_operand.vmem [shape: f32[20,10], index: 1, kind: input, shape index: {}]   ;;  %s454_s0 = inlined_call_operand.vmem [shape: f32[64,20], index: 0, kind: input, shape index: {}]   ;;  %s455_s2 = inlined_call_operand.vmem [shape: f32[1,10], index: 2, kind: input, shape index: {}]   ;;  %s456_s3 = inlined_call_operand.vmem [shape: f32[64,30], index: 3, kind: output, shape index: {}]  }
   0x1   :  { %v24_v0 = vld [vmem:[%s453_s1 + $0x10] sm:$0xf]  ;;  %v23_v1 = vld [vmem:[%s453_s1 + $0x8] sm:$0xff]  ;;  %v22_v2 = vld [vmem:[%s453_s1] sm:$0xff] }
   0x2   :  { %297 = vmatprep.subr.msk.mxu0 %vm57_vm0, %v24_v0  ;;  %315 = vmatprep.subr.msk.mxu1 %vm57_vm0, %v24_v0  ;;  %v14_v3 = vld [vmem:[%s454_s0] sm:$0xff]  ;;  %v15_v5 = vld [vmem:[%s454_s0 + $0x8] sm:$0xff]  ;;  %v16_v7 = vld [vmem:[%s454_s0 + $0x10] sm:$0xff] }
   0x3   :  { %298 = vmatpush3.msk.msra.mxu0 %vm57_vm0, %v24_v0  ;;  %318 = vmatpush3.msk.msra.mxu1 %vm57_vm0, %v24_v0  ;;  %v18_v4 = vld [vmem:[%s454_s0 + $0x20] sm:$0xff]  ;;  %v19_v6 = vld [vmem:[%s454_s0 + $0x28] sm:$0xff]  ;;  %v20_v8 = vld [vmem:[%s454_s0 + $0x30] sm:$0xff] }
   0x4   :  { %299 = vmatprep.subr.mxu0 %v23_v1  ;;  %316 = vmatprep.subr.mxu1 %v23_v1  ;;  %v17_v9 = vld [vmem:[%s454_s0 + $0x18] sm:$0xff]  ;;  %v276_v11 = vld [vmem:[%s455_s2] ss:$0 sm:$0xff] }
   0x5   :  { %300 = vmatpush3.msra.mxu0 %v23_v1  ;;  %319 = vmatpush3.msra.mxu1 %v23_v1  ;;  %v21_v10 = vld [vmem:[%s454_s0 + $0x38] sm:$0xff]  ;;  %s324_s0 = smov 20  }
   0x6   :  { %301 = vmatprep.subr.mxu0 %v22_v2  ;;  %317 = vmatprep.subr.mxu1 %v22_v2 }
   0x7   :  { %302 = vmatpush3.msra.mxu0 %v22_v2  ;;  %320 = vmatpush3.msra.mxu1 %v22_v2 }
   0x8   :  { %303 = vmatprep.mubr.msk.f32.mxu0 %vm32_vm1, %v14_v3  ;;  %309 = vmatprep.mubr.msk.f32.mxu1 %vm32_vm1, %v18_v4 }
   0x9   :  { %304 = vmatmul.mubr.msk.f32.vlgmr.msra.gmra.mxu0 %vm32_vm1, %v15_v5  ;;  %310 = vmatmul.mubr.msk.f32.vlgmr.msra.gmra.mxu1 %vm32_vm1, %v19_v6 }
   0xa   :  { %306 = vmatprep.mubr.msk.f32.mxu0 %vm32_vm1, %v16_v7  ;;  %312 = vmatprep.mubr.msk.f32.mxu1 %vm32_vm1, %v20_v8 }
   0xd   :  { %307 = vmatmul.mubr.msk.f32.gmra.mxu0 %vm32_vm1, %v17_v9  ;;  %313 = vmatmul.mubr.msk.f32.gmra.mxu1 %vm32_vm1, %v21_v10 }
  0xc9   :  { %v305_v12 = vpop.f32.mrf.mxu0  ;;  %v311_v13 = vpop.f32.mrf.mxu1 }
  0xca   :  { %v133_v14 = vadd.f32 %v305_v12, %v276_v11  ;;  %v153_v15 = vadd.f32 %v311_v13, %v276_v11 }
  0xcb   :  { %v127_v16 = vpop.f32.mrf.mxu0  ;;  %v147_v20 = vpop.f32.mrf.mxu1 }
  0xcc   :  { %v128_v17 = vadd.f32 %v276_v11, %v127_v16  ;;  %v171_v18 = vmax.f32 %v153_v15, 1.0  ;;  %v167_v19 = vmax.f32 %v133_v14, 1.0  ;;  %v148_v21 = vadd.f32 %v276_v11, %v147_v20 }
  0xcd   :  { %v175_v22 = vmin.f32 %v133_v14, 1.0  ;;  %v308_v24 = vpop.f32.mrf.mxu0  ;;  %v179_v26 = vmin.f32 %v153_v15, 1.0  ;;  %v314_v28 = vpop.f32.mrf.mxu1 }
  0xce   :  { %200 = vrot.lane.b32.xlu1 %v171_v18, %s323_s8  ;;  %192 = vrot.lane.b32.xlu0 %v167_v19, %s323_s8  ;;  %v166_v23 = vmax.f32 %v128_v17, 1.0  ;;  %v143_v25 = vadd.f32 %v308_v24, %v276_v11  ;;  %v170_v27 = vmax.f32 %v148_v21, 1.0  ;;  %v163_v29 = vadd.f32 %v314_v28, %v276_v11 }
  0xcf   :  { %v174_v31 = vmin.f32 %v128_v17, 1.0  ;;  %v157_v32 = vpop.f32.mrf.mxu1  ;;  %v178_v35 = vmin.f32 %v148_v21, 1.0  ;;  %v137_v36 = vpop.f32.mrf.mxu0 }
  0xd0   :  { %v169_v30 = vmax.f32 %v143_v25, 1.0  ;;  %v173_v33 = vmax.f32 %v163_v29, 1.0  ;;  %v158_v34 = vadd.f32 %v276_v11, %v157_v32  ;;  %v138_v37 = vadd.f32 %v276_v11, %v137_v36 }
  0xd1   :  { %v177_v38 = vmin.f32 %v143_v25, 1.0  ;;  %v181_v42 = vmin.f32 %v163_v29, 1.0 }
  0xd2   :  { %224 = vrot.lane.b32.xlu1 %v175_v22, %s324_s0  ;;  %190 = vrot.lane.b32.xlu0 %v166_v23, %s323_s8  ;;  %v172_v39 = vmax.f32 %v158_v34, 1.0  ;;  %v168_v40 = vmax.f32 %v138_v37, 1.0  ;;  %v176_v41 = vmin.f32 %v138_v37, 1.0  ;;  %v180_v43 = vmin.f32 %v158_v34, 1.0 }
  0xd6   :  { %232 = vrot.lane.b32.xlu1 %v179_v26, %s324_s0  ;;  %198 = vrot.lane.b32.xlu0 %v170_v27, %s323_s8 }
  0xda   :  { %196 = vrot.lane.b32.xlu1 %v169_v30, %s323_s8  ;;  %222 = vrot.lane.b32.xlu0 %v174_v31, %s324_s0 }
  0xde   :  { %204 = vrot.lane.b32.xlu1 %v173_v33, %s323_s8  ;;  %230 = vrot.lane.b32.xlu0 %v178_v35, %s324_s0 }
  0xe2   :  { %228 = vrot.lane.b32.xlu1 %v177_v38, %s324_s0  ;;  %202 = vrot.lane.b32.xlu0 %v172_v39, %s323_s8 }
  0xe6   :  { %194 = vrot.lane.b32.xlu1 %v168_v40, %s323_s8  ;;  %226 = vrot.lane.b32.xlu0 %v176_v41, %s324_s0 }
  0xea   :  { %236 = vrot.lane.b32.xlu1 %v181_v42, %s324_s0  ;;  %234 = vrot.lane.b32.xlu0 %v180_v43, %s324_s0 }
 0x140   :  { %v201_v44 = vpop.permute.xlu1 %200  ;;  %v193_v45 = vpop.permute.xlu0 %192 }
 0x141   :  { %v248_v46 = vsel %vm246_vm2, %v133_v14, %v193_v45  ;;  %v252_v50 = vsel %vm246_vm2, %v153_v15, %v201_v44 }
 0x144   :  { %v225_v47 = vpop.permute.xlu1 %224  ;;  %v191_v48 = vpop.permute.xlu0 %190 }
 0x145   :  { %v256_v49 = vsel %vm32_vm1, %v248_v46, %v225_v47  ;;  %v247_v54 = vsel %vm246_vm2, %v128_v17, %v191_v48 }
 0x146   :  { %265 = vst.msk [vmem:[%s456_s3 + $0x8] sm:$0xff] %vm263_vm3, %v256_v49 }
 0x148   :  { %v233_v51 = vpop.permute.xlu1 %232  ;;  %v199_v52 = vpop.permute.xlu0 %198 }
 0x149   :  { %v260_v53 = vsel %vm32_vm1, %v252_v50, %v233_v51  ;;  %v251_v58 = vsel %vm246_vm2, %v148_v21, %v199_v52 }
 0x14a   :  { %269 = vst.msk [vmem:[%s456_s3 + $0x28] sm:$0xff] %vm263_vm3, %v260_v53 }
 0x14c   :  { %v197_v55 = vpop.permute.xlu1 %196  ;;  %v223_v56 = vpop.permute.xlu0 %222 }
 0x14d   :  { %v255_v57 = vsel %vm32_vm1, %v247_v54, %v223_v56  ;;  %v250_v62 = vsel %vm246_vm2, %v143_v25, %v197_v55 }
 0x14e   :  { %264 = vst.msk [vmem:[%s456_s3] sm:$0xff] %vm263_vm3, %v255_v57 }
 0x150   :  { %v205_v59 = vpop.permute.xlu1 %204  ;;  %v231_v60 = vpop.permute.xlu0 %230 }
 0x151   :  { %v259_v61 = vsel %vm32_vm1, %v251_v58, %v231_v60  ;;  %v254_v6 = vsel %vm246_vm2, %v163_v29, %v205_v59 }
 0x152   :  { %268 = vst.msk [vmem:[%s456_s3 + $0x20] sm:$0xff] %vm263_vm3, %v259_v61 }
 0x154   :  { %v229_v63 = vpop.permute.xlu1 %228  ;;  %v203_v0 = vpop.permute.xlu0 %202 }
 0x155   :  { %v258_v1 = vsel %vm32_vm1, %v250_v62, %v229_v63  ;;  %v253_v7 = vsel %vm246_vm2, %v158_v34, %v203_v0 }
 0x156   :  { %267 = vst.msk [vmem:[%s456_s3 + $0x18] sm:$0xff] %vm263_vm3, %v258_v1 }
 0x158   :  { %v195_v2 = vpop.permute.xlu1 %194  ;;  %v227_v3 = vpop.permute.xlu0 %226 }
 0x159   :  { %v249_v4 = vsel %vm246_vm2, %v138_v37, %v195_v2 }
 0x15a   :  { %v257_v5 = vsel %vm32_vm1, %v249_v4, %v227_v3 }
 0x15b   :  { %266 = vst.msk [vmem:[%s456_s3 + $0x10] sm:$0xff] %vm263_vm3, %v257_v5 }
 0x15c   :  { %v237_v8 = vpop.permute.xlu1 %236  ;;  %v235_v9 = vpop.permute.xlu0 %234 }
 0x15d   :  { %v262_v10 = vsel %vm32_vm1, %v254_v6, %v237_v8  ;;  %v261_v11 = vsel %vm32_vm1, %v253_v7, %v235_v9 }
 0x15e   :  { %271 = vst.msk [vmem:[%s456_s3 + $0x38] sm:$0xff] %vm263_vm3, %v262_v10  ;;  %270 = vst.msk [vmem:[%s456_s3 + $0x30] sm:$0xff] %vm263_vm3, %v261_v11 }

</bundles_post_ra>
